<compile_context>
chip_gen: v6e
topology: v6e:2x2x1
jax: 0.10.0
libtpu: 0.0.40
codegen_flags: <defaults>
</compile_context>

<pallas_src>
import functools

import jax
import jax.numpy as jnp
from jax import lax
from jax.experimental import pallas as pl
from jax.experimental.pallas import tpu as pltpu

# ------------------------- model hyper-parameters -------------------------
C_IN = 4
C_OUT = 8
K = 3
PAD = 1
D_EMB = 32
KKC = K * K * C_IN          # 36: im2col contraction size

BT_MAX = 128                # max images per grid step (~3 MB bf16 patch tile)


def _choose_bt(n):
    """Images per grid step: large enough to amortize per-step overhead, but
    always split into >= 2 grid steps when possible (v7x megacore)."""
    if n <= 1:
        return 1
    return min(BT_MAX, -(-n // 2))


# ------------------------------ Pallas kernel ------------------------------
def _embed_kernel(p_ref, wc_ref, bc_ref, wf_ref, bf_ref, o_ref, *, bt, hw):
    """Fused conv(3x3,pad=1) + ReLU + global-avg-pool + FC, channels-on-sublane.

    p_ref : (KKC, bt*hw)    bf16  transposed im2col patches (lane-dense rows)
    wc_ref: (C_OUT, KKC)    bf16  conv weight, tap-major contraction layout
    bc_ref: (C_OUT, 1)      f32
    wf_ref: (D_EMB, C_OUT)  f32
    bf_ref: (D_EMB, 1)      f32
    o_ref : (D_EMB, bt)     f32   embeddings, batch on the lane axis
    """
    # Whole conv as a single MXU contraction: (8, 36) @ (36, bt*hw).
    conv = jnp.dot(wc_ref[...], p_ref[...],
                   preferred_element_type=jnp.float32)          # (C_OUT, rows)
    hidden = jnp.maximum(conv + bc_ref[...], 0.0)               # (C_OUT, rows)
    pooled = jnp.mean(hidden.reshape(C_OUT, bt, hw), axis=-1)   # (C_OUT, bt)
    o_ref[...] = (jnp.dot(wf_ref[...], pooled,
                          preferred_element_type=jnp.float32) + bf_ref[...])


# --------------------------- batched embedding -----------------------------
def _embed_batch(params, x_nchw):
    """Embeddings for a batch of NCHW images via one fused pallas_call."""
    n, c, hh, ww = x_nchw.shape
    assert c == C_IN
    hw = hh * ww
    bt = _choose_bt(n)
    g = -(-n // bt)
    n_pad = g * bt

    # Transposed im2col in the wrapper (bf16): contraction dim (ki,kj,c) on the
    # sublane axis, (image, h, w) rows on the lane axis.  For these sizes this
    # costs only a few hundred KB of HBM and removes all per-tap slicing and
    # relayout work from the kernel.
    xp = jnp.pad(x_nchw.astype(jnp.bfloat16),
                 ((0, 0), (0, 0), (PAD, PAD), (PAD, PAD)))
    taps = [xp[:, :, di:di + hh, dj:dj + ww]
            for di in range(K) for dj in range(K)]               # 9 x (n,C,H,W)
    p = jnp.stack(taps, axis=0)                                   # (9,n,C,H,W)
    p = jnp.transpose(p, (0, 2, 1, 3, 4)).reshape(KKC, n, hw)     # (36, n, HW)
    if n_pad != n:
        p = jnp.pad(p, ((0, 0), (0, n_pad - n), (0, 0)))
    p = p.reshape(KKC, g, bt * hw).transpose(1, 0, 2)             # (g, 36, bt*HW)

    # Repack weights (tiny; fused into the surrounding jit).
    wc = jnp.transpose(params["w_conv"], (0, 2, 3, 1))            # (O,kH,kW,I)
    wc = wc.reshape(C_OUT, KKC).astype(jnp.bfloat16)              # (8, 36)
    bc = params["b_conv"].reshape(C_OUT, 1).astype(jnp.float32)
    wf = params["w_fc"].astype(jnp.float32)                       # (D_EMB, C_OUT)
    bf = params["b_fc"].reshape(D_EMB, 1).astype(jnp.float32)

    kernel = functools.partial(_embed_kernel, bt=bt, hw=hw)
    out = pl.pallas_call(
        kernel,
        out_shape=jax.ShapeDtypeStruct((g, D_EMB, bt), jnp.float32),
        grid_spec=pltpu.PrefetchScalarGridSpec(
            num_scalar_prefetch=0,
            grid=(g,),
            in_specs=[
                # Per-step patch tile: lane-dense (36, bt*hw) bf16.
                pl.BlockSpec((None, KKC, bt * hw), lambda i: (i, 0, 0)),
                # Weights / biases pinned resident (same block every step).
                pl.BlockSpec((C_OUT, KKC), lambda i: (0, 0)),
                pl.BlockSpec((C_OUT, 1), lambda i: (0, 0)),
                pl.BlockSpec((D_EMB, C_OUT), lambda i: (0, 0)),
                pl.BlockSpec((D_EMB, 1), lambda i: (0, 0)),
            ],
            out_specs=pl.BlockSpec((None, D_EMB, bt), lambda i: (i, 0, 0)),
        ),
        compiler_params=pltpu.CompilerParams(
            dimension_semantics=("parallel",),
            vmem_limit_bytes=32 * 1024 * 1024,
        ),
    )(p, wc, bc, wf, bf)

    # (g, D_EMB, bt) -> (n, D_EMB); tiny transpose handled by XLA.
    return jnp.transpose(out, (0, 2, 1)).reshape(n_pad, D_EMB)[:n]


# --------------------------------- API --------------------------------------
@jax.jit
def face_triplet_net(params, x1, x2, x3):
    """Pallas equivalent of FaceTripletNet.forward: shared-weight triplet,
    executed as a single batched pass / single kernel dispatch."""
    b = x1.shape[0]
    x = jnp.concatenate([x1, x2, x3], axis=0)   # (3B, C, H, W)
    emb = _embed_batch(params, x)               # (3B, D_EMB)
    return emb[:b], emb[b:2 * b], emb[2 * b:]


get_embedding = jax.jit(_embed_batch)           # FaceTripletNet.get_embedding


def init_params(seed=0):
    """Deterministic synthetic weights in PyTorch layouts."""
    key = jax.random.PRNGKey(seed)
    k1, k2, k3, k4 = jax.random.split(key, 4)
    w_conv = jax.random.normal(k1, (C_OUT, C_IN, K, K), jnp.float32)
    w_conv = w_conv * (2.0 / (C_IN * K * K)) ** 0.5           # (O, I, kH, kW)
    b_conv = 0.01 * jax.random.normal(k2, (C_OUT,), jnp.float32)
    w_fc = jax.random.normal(k3, (D_EMB, C_OUT), jnp.float32) * (1.0 / C_OUT) ** 0.5
    b_fc = 0.01 * jax.random.normal(k4, (D_EMB,), jnp.float32)
    return dict(w_conv=w_conv, b_conv=b_conv, w_fc=w_fc, b_fc=b_fc)


# ------------------------- pure-JAX f32 reference ---------------------------
def _embed_reference(params, x_nchw):
    y = lax.conv_general_dilated(
        x_nchw.astype(jnp.float32), params["w_conv"],
        window_strides=(1, 1), padding=((PAD, PAD), (PAD, PAD)),
        dimension_numbers=("NCHW", "OIHW", "NCHW"))
    y = jnp.maximum(y + params["b_conv"][None, :, None, None], 0.0)
    pooled = jnp.mean(y, axis=(2, 3))
    return pooled @ params["w_fc"].T + params["b_fc"]


# ---------------------------------- main ------------------------------------
if __name__ == "__main__":
    key = jax.random.PRNGKey(0)
    kx1, kx2, kx3 = jax.random.split(key, 3)
    B, H, W = 2, 16, 16
    x1 = jax.random.normal(kx1, (B, C_IN, H, W), jnp.float32)
    x2 = jax.random.normal(kx2, (B, C_IN, H, W), jnp.float32)
    x3 = jax.random.normal(kx3, (B, C_IN, H, W), jnp.float32)

    params = init_params(seed=0)
    o1, o2, o3 = face_triplet_net(params, x1, x2, x3)
    jax.block_until_ready((o1, o2, o3))

    assert o1.shape == (B, D_EMB) and o2.shape == (B, D_EMB) and o3.shape == (B, D_EMB)
    assert o1.dtype == jnp.float32

    # Numerical check vs. pure-JAX f32 reference (kernel conv matmul is bf16).
    r1 = _embed_reference(params, x1)
    r2 = _embed_reference(params, x2)
    r3 = _embed_reference(params, x3)
    assert jnp.allclose(o1, r1, atol=3e-2, rtol=3e-2)
    assert jnp.allclose(o2, r2, atol=3e-2, rtol=3e-2)
    assert jnp.allclose(o3, r3, atol=3e-2, rtol=3e-2)

    # Shared weights => identical inputs give identical embeddings.
    o1b, o2b, _ = face_triplet_net(params, x1, x1, x3)
    assert jnp.allclose(o1, o1b)
    assert jnp.allclose(o1b, o2b)

    print("KERNEL_OK")
</pallas_src>

<mosaic_0001>
module attributes {stable_mosaic.version = 11 : i64} {
  func.func @_embed_kernel(%arg0: i32, %arg1: memref<1x36x768xbf16, #tpu.memory_space<vmem>>, %arg2: memref<8x36xbf16, #tpu.memory_space<vmem>>, %arg3: memref<8x1xf32, #tpu.memory_space<vmem>>, %arg4: memref<32x8xf32, #tpu.memory_space<vmem>>, %arg5: memref<32x1xf32, #tpu.memory_space<vmem>>, %arg6: memref<1x32x3xf32, #tpu.memory_space<vmem>>) attributes {dimension_semantics = [#tpu.dimension_semantics<parallel>], iteration_bounds = array<i64: 2>, scalar_prefetch = 0 : i64, scratch_operands = 0 : i64, tpu.core_type = #tpu.core_type<tc>, window_params = [{transform_indices = @transform_0, window_bounds = array<i64: 1, 36, 768>}, {pipeline_mode = #tpu.pipeline_mode<synchronous>, transform_indices = @transform_1, window_bounds = array<i64: 8, 36>}, {pipeline_mode = #tpu.pipeline_mode<synchronous>, transform_indices = @transform_2, window_bounds = array<i64: 8, 1>}, {pipeline_mode = #tpu.pipeline_mode<synchronous>, transform_indices = @transform_3, window_bounds = array<i64: 32, 8>}, {pipeline_mode = #tpu.pipeline_mode<synchronous>, transform_indices = @transform_4, window_bounds = array<i64: 32, 1>}, {transform_indices = @transform_5, window_bounds = array<i64: 1, 32, 3>}]} {
    %c0 = arith.constant 0 : index
    %c0_0 = arith.constant 0 : index
    %0 = vector.load %arg2[%c0, %c0_0] : memref<8x36xbf16, #tpu.memory_space<vmem>>, vector<8x36xbf16>
    %c0_1 = arith.constant 0 : index
    %c0_2 = arith.constant 0 : index
    %c0_3 = arith.constant 0 : index
    %1 = vector.load %arg1[%c0_1, %c0_2, %c0_3] : memref<1x36x768xbf16, #tpu.memory_space<vmem>>, vector<1x36x768xbf16>
    %2 = vector.shape_cast %1 : vector<1x36x768xbf16> to vector<36x768xbf16>
    %cst = arith.constant dense<0.000000e+00> : vector<8x768xf32>
    %3 = tpu.matmul %0, %2, %cst {dimension_numbers = #tpu.dot_dimension_numbers<[1], [0], [0], [1], [0, 0, 1, 1], [], []>} : vector<8x36xbf16>, vector<36x768xbf16>, vector<8x768xf32> -> vector<8x768xf32>
    %c0_4 = arith.constant 0 : index
    %c0_5 = arith.constant 0 : index
    %4 = vector.load %arg3[%c0_4, %c0_5] : memref<8x1xf32, #tpu.memory_space<vmem>>, vector<8x1xf32>
    %5 = vector.broadcast %4 : vector<8x1xf32> to vector<8x768xf32>
    %6 = arith.addf %3, %5 : vector<8x768xf32>
    %cst_6 = arith.constant 0.000000e+00 : f32
    %7 = vector.broadcast %cst_6 : f32 to vector<8x768xf32>
    %8 = arith.maximumf %6, %7 : vector<8x768xf32>
    %9 = vector.shape_cast %8 : vector<8x768xf32> to vector<8x3x256xf32>
    %cst_7 = arith.constant dense<0.000000e+00> : vector<8x3xf32>
    %10 = vector.multi_reduction <add>, %9, %cst_7 [2] : vector<8x3x256xf32> to vector<8x3xf32>
    %cst_8 = arith.constant 2.560000e+02 : f32
    %11 = vector.broadcast %cst_8 : f32 to vector<8x3xf32>
    %12 = arith.divf %10, %11 : vector<8x3xf32>
    %c0_9 = arith.constant 0 : index
    %c0_10 = arith.constant 0 : index
    %13 = vector.load %arg4[%c0_9, %c0_10] : memref<32x8xf32, #tpu.memory_space<vmem>>, vector<32x8xf32>
    %cst_11 = arith.constant dense<0.000000e+00> : vector<32x3xf32>
    %14 = tpu.matmul %13, %12, %cst_11 {dimension_numbers = #tpu.dot_dimension_numbers<[1], [0], [0], [1], [0, 0, 1, 1], [], []>} : vector<32x8xf32>, vector<8x3xf32>, vector<32x3xf32> -> vector<32x3xf32>
    %c0_12 = arith.constant 0 : index
    %c0_13 = arith.constant 0 : index
    %15 = vector.load %arg5[%c0_12, %c0_13] : memref<32x1xf32, #tpu.memory_space<vmem>>, vector<32x1xf32>
    %16 = vector.broadcast %15 : vector<32x1xf32> to vector<32x3xf32>
    %17 = arith.addf %14, %16 : vector<32x3xf32>
    %c0_14 = arith.constant 0 : index
    %c0_15 = arith.constant 0 : index
    %c0_16 = arith.constant 0 : index
    %18 = vector.load %arg6[%c0_14, %c0_15, %c0_16] : memref<1x32x3xf32, #tpu.memory_space<vmem>>, vector<1x32x3xf32>
    %19 = vector.shape_cast %18 : vector<1x32x3xf32> to vector<32x3xf32>
    %20 = vector.shape_cast %17 : vector<32x3xf32> to vector<1x32x3xf32>
    tpu.vector_store %arg6[%c0_14, %c0_15, %c0_16], %20 {strides = array<i32>} : memref<1x32x3xf32, #tpu.memory_space<vmem>>, vector<1x32x3xf32>,
    return
  }
  func.func @transform_0(%arg0: i32) -> (i32, i32, i32) {
    %c0_i32 = arith.constant 0 : i32
    %c0_i32_0 = arith.constant 0 : i32
    %c0_i32_1 = arith.constant 0 : i32
    return %arg0, %c0_i32, %c0_i32_0 : i32, i32, i32
  }
  func.func @transform_1(%arg0: i32) -> (i32, i32) {
    %c0_i32 = arith.constant 0 : i32
    %c0_i32_0 = arith.constant 0 : i32
    %c0_i32_1 = arith.constant 0 : i32
    return %c0_i32, %c0_i32_0 : i32, i32
  }
  func.func @transform_2(%arg0: i32) -> (i32, i32) {
    %c0_i32 = arith.constant 0 : i32
    %c0_i32_0 = arith.constant 0 : i32
    %c0_i32_1 = arith.constant 0 : i32
    return %c0_i32, %c0_i32_0 : i32, i32
  }
  func.func @transform_3(%arg0: i32) -> (i32, i32) {
    %c0_i32 = arith.constant 0 : i32
    %c0_i32_0 = arith.constant 0 : i32
    %c0_i32_1 = arith.constant 0 : i32
    return %c0_i32, %c0_i32_0 : i32, i32
  }
  func.func @transform_4(%arg0: i32) -> (i32, i32) {
    %c0_i32 = arith.constant 0 : i32
    %c0_i32_0 = arith.constant 0 : i32
    %c0_i32_1 = arith.constant 0 : i32
    return %c0_i32, %c0_i32_0 : i32, i32
  }
  func.func @transform_5(%arg0: i32) -> (i32, i32, i32) {
    %c0_i32 = arith.constant 0 : i32
    %c0_i32_0 = arith.constant 0 : i32
    %c0_i32_1 = arith.constant 0 : i32
    return %arg0, %c0_i32, %c0_i32_0 : i32, i32, i32
  }
}

</mosaic_0001>

<bundles_post_ra>
// kernel: face_triplet_net.1
= control target key start
LH: loop header
LB: loop body
LE: loop exit
PB: predicated region body
PF: predicated region fallthrough
CT: control target
= control target key end

     0   :  { %s1035_s18 = smov 0   ;;  %s1152_s0 = inlined_call_operand.vmem [shape: bf16[2,36,768], index: 0, kind: input, shape index: {}]   ;;  %s1153_s1 = inlined_call_operand.vmem [shape: bf16[8,36], index: 1, kind: input, shape index: {}]   ;;  %s1154_s2 = inlined_call_operand.vmem [shape: f32[8,1], index: 2, kind: input, shape index: {}]   ;;  %s1155_s3 = inlined_call_operand.vmem [shape: f32[32,8], index: 3, kind: input, shape index: {}]   ;;  %s1156_s4 = inlined_call_operand.vmem [shape: f32[32,1], index: 4, kind: input, shape index: {}]   ;;  %s1157_s5 = inlined_call_operand.vmem [shape: f32[2,32,3], index: 5, kind: output, shape index: {}]  }
   0x1 LB: > { %s902_s19 = sadd.s32 4294967295, %s999_s18   ;;  %p906_p0 = scmp.ge.s32.totalorder %s999_s18, 1  ;;  %s999_s18 = sphi %s1035_s18, %s15_s18  }
   0x2   : > { %p187_p1 = scmp.lt.s32.totalorder %s999_s18, 3 }
   0x4   : > { %p188_p2 = pnand %p906_p0, %p187_p1 }
   0x5   : > { %p215_p3 = scmp.lt.s32.totalorder (!%p188_p2), %s902_s19, 1 }
   0x6   : > { %191 = sbr.rel (%p188_p2) target bundleno = 623 (0x26f), region = 40 }
   0xb   : > { %v1001_v0 = vmov 0   ;;  %v242_v1 = vld [vmem:[%s1154_s2] sm:$0xff]  ;;  %s1159_s19 = smov (!%p215_p3, %s902_s19), 1  ;;  %vm327_vm0 = vcmask 1041408   ;;  %vm323_vm1 = vcmask 293888   ;;  %v480_v27 = vlaneseq }
   0xc   : > { %378 = vmatprep.mubr.bf16.mxu0 %v1001_v0  ;;  %419 = vmatprep.mubr.bf16.mxu1 %v1001_v0  ;;  %s954_s22 = smul.u32 120, %s1159_s19  ;;  %v226_v21 = vld [vmem:[%s1153_s1] sm:$0xf]  ;;  %v1002_v37 = vmov 1983009808   ;;  %v1004_v54 = vmov 0.0  }
   0xd   : > { %967 = vset.pattern.permute.xlu0 %v1001_v0  ;;  %968 = vset.pattern.permute.xlu1 %v1001_v0  ;;  %v481_v28 = vshrl.u32 %v480_v27, 7  ;;  %v696_v29 = vand.u32 127, %v480_v27  ;;  %v478_v38 = vunpack.c.l.s4 %v1002_v37  ;;  %v1003_v46 = vmov 1934713408   ;;  %s940_s21 = sshll.u32 %s1159_s19, 5 }
   0xe   : > { %245 = vperm.xlu0 %967, %v242_v1   ;;  %s1052_s25 = scalar_lea.vmem %s1152_s0, %s954_s22  ;;  %v509_v47 = vunpack.c.l.s4 %v1003_v46  ;;  %vm609_vm2 = vcmask 1042432   ;;  %vm744_vm3 = vcmask 64512   ;;  %vm729_vm4 = vcmask 1041409   ;;  %s224_s24 = scalar_lea.vmem %s1157_s5, %s940_s21 }
   0xf   : > { %v239_v2 = vld [vmem:[%s1052_s25 + $0x60] sm:$0x33]  ;;  %v971_v5 = vld [vmem:[%s1052_s25 + $0x34] ss:$24 sps:$4 sm:$0xff]   ;;  %v973_v10 = vld [vmem:[%s1052_s25 + $0x30] ss:$24 sps:$4 sm:$0xff]   ;;  %v1081_v30 = vsub.s32 %v696_v29, %v481_v28  ;;  %v479_v44 = vunpack.c.0.s8 %v478_v38 }
  0x10   : > { %v923_v3 = vcombine.high %v239_v2, %v239_v2  ;;  %v922_v4 = vcombine.low %v239_v2, %v239_v2  ;;  %v240_v6 = vld [vmem:[%s1052_s25 + $0x68] sm:$0x33]  ;;  %v974_v11 = vld [vmem:[%s1052_s25 + $0x4] ss:$24 sps:$4 sm:$0xff]   ;;  %v241_v14 = vld [vmem:[%s1052_s25 + $0x70] sm:$0x33]  ;;  %v510_v57 = vunpack.c.0.s8 %v509_v47 }
  0x11   : > { %v925_v8 = vcombine.high %v240_v6, %v240_v6  ;;  %v924_v9 = vcombine.low %v240_v6, %v240_v6  ;;  %v979_v12 = vld [vmem:[%s1052_s25 + $0x3c] ss:$24 sps:$4 sm:$0xff]   ;;  %v982_v15 = vld [vmem:[%s1052_s25 + $0x38] ss:$24 sps:$4 sm:$0xff]   ;;  %v984_v16 = vld [vmem:[%s1052_s25 + $0xc] ss:$24 sps:$4 sm:$0xff]   ;;  %v927_v18 = vcombine.high %v241_v14, %v241_v14  ;;  %v926_v19 = vcombine.low %v241_v14, %v241_v14 }
  0x12   : > { %928 = vmatprep.subr.msk.bf16.mxu0 %vm327_vm0, %v923_v3  ;;  %v329_v7 = vsel %vm327_vm0, %v922_v4, 0  ;;  %v977_v17 = vld [vmem:[%s1052_s25] ss:$24 sps:$4 sm:$0xff]   ;;  %v988_v23 = vld [vmem:[%s1052_s25 + $0x44] ss:$24 sps:$4 sm:$0xff]   ;;  %v482_v52 = vsub.s32 %v479_v44, %v481_v28  ;;  %v513_v6 = vsub.s32 %v510_v57, %v481_v28  ;;  %vm731_vm5 = vcmask 1042434  }
  0x13   : > { %357 = vmatpush1.bf16.msra.mxu0 %v329_v7  ;;  %930 = vmatprep.subr.msk.bf16.mxu1 %vm327_vm0, %v925_v8  ;;  %v335_v13 = vsel %vm327_vm0, %v924_v9, 0  ;;  %v989_v20 = vld [vmem:[%s1052_s25 + $0x8] ss:$24 sps:$4 sm:$0xff]   ;;  %v341_v22 = vsel %vm327_vm0, %v926_v19, 0  ;;  %v992_v25 = vld [vmem:[%s1052_s25 + $0x14] ss:$24 sps:$4 sm:$0xff]  }
  0x14   : > { %358 = vmatprep.subr.bf16.mxu0 %v971_v5  ;;  %398 = vmatpush1.bf16.msra.mxu1 %v335_v13  ;;  %v986_v24 = vld [vmem:[%s1052_s25 + $0x40] ss:$24 sps:$4 sm:$0xff]   ;;  %v990_v26 = vld [vmem:[%s1052_s25 + $0x10] ss:$24 sps:$4 sm:$0xff]   ;;  %vm733_vm6 = vcmask 1043459   ;;  %vm735_vm7 = vcmask 1044484  }
  0x15   : > { %399 = vmatprep.subr.bf16.mxu1 %v979_v12  ;;  %vm737_vm8 = vcmask 1045509   ;;  %vm739_vm9 = vcmask 1046534   ;;  %vm741_vm10 = vcmask 1047559   ;;  %vm842_vm11 = vcmask 23552  }
  0x17   : > { %359 = vmatpush1.bf16.msra.mxu0 %v973_v10 }
  0x18   : > { %360 = vmatprep.subr.bf16.mxu0 %v974_v11  ;;  %400 = vmatpush1.bf16.msra.mxu1 %v982_v15 }
  0x19   : > { %401 = vmatprep.subr.bf16.mxu1 %v984_v16 }
  0x1b   : > { %361 = vmatpush1.bf16.msra.mxu0 %v977_v17 }
  0x1c   : > { %932 = vmatprep.subr.msk.bf16.mxu0 %vm327_vm0, %v927_v18  ;;  %402 = vmatpush1.bf16.msra.mxu1 %v989_v20 }
  0x1e   : > { %929 = vmatmul.mubr.msk.bf16.vlgmr.msra.gmra.mxu0 %vm323_vm1, %v226_v21 }
  0x1f   : > { %439 = vmatpush1.bf16.msra.mxu0 %v341_v22  ;;  %460 = vmatprep.mubr.bf16.mxu0 %v1001_v0 }
  0x20   : > { %440 = vmatprep.subr.bf16.mxu0 %v988_v23  ;;  %931 = vmatmul.mubr.msk.bf16.vlgmr.msra.gmra.mxu1 %vm323_vm1, %v226_v21 }
  0x23   : > { %441 = vmatpush1.bf16.msra.mxu0 %v986_v24 }
  0x24   : > { %442 = vmatprep.subr.bf16.mxu0 %v992_v25 }
  0x27   : > { %443 = vmatpush1.bf16.msra.mxu0 %v990_v26 }
  0x2a   : > { %933 = vmatmul.mubr.msk.bf16.vlgmr.msra.gmra.mxu0 %vm323_vm1, %v226_v21 }
  0x89   : > { %v246_v36 = vpop.permute.xlu0 %245 }
  0xde   : > { %v380_v31 = vpop.f32.mrf.mxu0 }
  0xdf   : > { %v381_v48 = vadd.f32 %v380_v31, %v246_v36 }
  0xe0   : > { %v382_v32 = vpop.f32.mrf.mxu0  ;;  %v421_v33 = vpop.f32.mrf.mxu1 }
  0xe1   : > { %v422_v40 = vadd.f32 %v421_v33, %v246_v36  ;;  %v383_v49 = vadd.f32 %v382_v32, %v246_v36  ;;  %v469_v58 = vmax.f32 %v381_v48, 0.0 }
  0xe2   : > { %v384_v34 = vpop.f32.mrf.mxu0  ;;  %v423_v35 = vpop.f32.mrf.mxu1 }
  0xe3   : > { %v424_v42 = vadd.f32 %v423_v35, %v246_v36  ;;  %v471_v45 = vmax.f32 %v422_v40, 0.0  ;;  %v470_v61 = vmax.f32 %v383_v49, 0.0 }
  0xe4   : > { %v385_v39 = vpop.f32.mrf.mxu0  ;;  %v425_v41 = vpop.f32.mrf.mxu1 }
  0xe5   : > { %v472_v50 = vmax.f32 %v424_v42, 0.0  ;;  %v491_v55 = vcombine.high %v471_v45, %v1004_v54  ;;  %v498_v0 = vrot.slane %v471_v45, %v482_v52 }
  0xe6   : > { %v426_v43 = vpop.f32.mrf.mxu1 }
  0xe7   : > { %v558_v62 = vcombine.high %v472_v50, %v1004_v54  ;;  %v505_v4 = vrot.slane %v491_v55, %v482_v52  ;;  %v565_v11 = vrot.slane %v472_v50, %v482_v52 }
  0xe9   : > { %v572_v12 = vrot.slane %v558_v62, %v482_v52  ;;  %v664_v62 = vld [vmem:[%s1156_s4 + $0x8] sm:$0xff] }
  0xea   : > { %v462_v51 = vpop.f32.mrf.mxu0 }
  0xeb   : > { %v463_v53 = vadd.f32 %v462_v51, %v246_v36 }
  0xec   : > { %v464_v56 = vpop.f32.mrf.mxu0 }
  0xed   : > { %v473_v59 = vmax.f32 %v463_v53, 0.0  ;;  %v465_v60 = vadd.f32 %v464_v56, %v246_v36 }
  0xee   : > { %v466_v63 = vpop.f32.mrf.mxu0 }
  0xef   : > { %v475_v1 = vcombine.low %v469_v58, %v473_v59  ;;  %v476_v2 = vcombine.high %v469_v58, %v473_v59  ;;  %v474_v3 = vmax.f32 %v465_v60, 0.0 }
  0xf0   : > { %v467_v5 = vpop.f32.mrf.mxu0 }
  0xf1   : > { %v483_v7 = vrot.slane %v475_v1, %v482_v52  ;;  %v490_v8 = vrot.slane %v476_v2, %v482_v52  ;;  %v542_v9 = vcombine.low %v470_v61, %v474_v3  ;;  %v543_v10 = vcombine.high %v470_v61, %v474_v3  ;;  %v659_v2 = vld [vmem:[%s1155_s3] sm:$0xff]  ;;  %v665_v3 = vld [vmem:[%s1156_s4 + $0x10] sm:$0xff] }
  0xf2   : > { %948 = vmatprep.mubr.msk.f32.mxu1 %vm744_vm3, %v659_v2 }
  0xf3   : > { %v550_v13 = vrot.slane %v542_v9, %v482_v52  ;;  %v557_v14 = vrot.slane %v543_v10, %v482_v52  ;;  %v507_v15 = vcombine.high %v483_v7, %v498_v0  ;;  %v506_v16 = vcombine.low %v483_v7, %v498_v0 }
  0xf4   : > { %v522_v17 = vcombine.low %v490_v8, %v505_v4  ;;  %v523_v28 = vcombine.high %v490_v8, %v505_v4  ;;  %v666_v4 = vld [vmem:[%s1156_s4 + $0x18] sm:$0xff] }
  0xf5   : > { %v521_v18 = vrot.slane %v507_v15, %v513_v6  ;;  %v574_v19 = vcombine.high %v550_v13, %v565_v11  ;;  %v514_v20 = vrot.slane %v506_v16, %v513_v6  ;;  %v573_v21 = vcombine.low %v550_v13, %v565_v11 }
  0xf6   : > { %v589_v22 = vcombine.low %v557_v14, %v572_v12  ;;  %v590_v25 = vcombine.high %v557_v14, %v572_v12  ;;  %v530_v26 = vrot.slane %v522_v17, %v513_v6  ;;  %v537_v39 = vrot.slane %v523_v28, %v513_v6 }
  0xf7   : > { %v588_v23 = vrot.slane %v574_v19, %v513_v6  ;;  %v581_v24 = vrot.slane %v573_v21, %v513_v6  ;;  %v620_v29 = vsel %vm609_vm2, %v521_v18, 0.0  ;;  %v610_v32 = vsel %vm609_vm2, %v514_v20, 0.0 }
  0xf8   : > { %v597_v27 = vrot.slane %v589_v22, %v513_v6  ;;  %v604_v37 = vrot.slane %v590_v25, %v513_v6  ;;  %v630_v38 = vsel %vm609_vm2, %v530_v26, 0.0  ;;  %v640_v43 = vsel %vm609_vm2, %v537_v39, 0.0 }
  0xf9   : > { %v621_v31 = vsel %vm609_vm2, %v588_v23, 0.0  ;;  %v611_v33 = vsel %vm609_vm2, %v581_v24, 0.0  ;;  %v605_v42 = vcombine.high %v581_v24, %v1004_v54  ;;  %v538_v44 = vcombine.high %v514_v20, %v1004_v54 }
  0xfa   : > { %v622_v34 = vadd.f32 %v621_v31, %v620_v29  ;;  %v612_v35 = vadd.f32 %v611_v33, %v610_v32  ;;  %v631_v36 = vsel %vm609_vm2, %v597_v27, 0.0  ;;  %v641_v41 = vsel %vm609_vm2, %v604_v37, 0.0 }
  0xfb   : > { %v632_v40 = vadd.f32 %v631_v36, %v630_v38  ;;  %v642_v45 = vadd.f32 %v641_v41, %v640_v43  ;;  %v616_v46 = vsel %vm609_vm2, %v605_v42, 0.0  ;;  %v606_v47 = vcombine.high %v588_v23, %v1004_v54  ;;  %v661_v38 = vld [vmem:[%s1155_s3 + $0x10] sm:$0xff] }
  0xfc   : > { %623 = vadd.xlane.f32.xlu1 %v622_v34  ;;  %613 = vadd.xlane.f32.xlu0 %v612_v35  ;;  %v615_v48 = vsel %vm609_vm2, %v538_v44, 0.0  ;;  %v539_v49 = vcombine.high %v521_v18, %v1004_v54  ;;  %v607_v52 = vcombine.high %v597_v27, %v1004_v54  ;;  %v540_v55 = vcombine.high %v530_v26, %v1004_v54 }
  0xfd   : > { %v617_v50 = vadd.f32 %v616_v46, %v615_v48  ;;  %v626_v51 = vsel %vm609_vm2, %v606_v47, 0.0  ;;  %v608_v58 = vcombine.high %v604_v37, %v1004_v54  ;;  %v541_v60 = vcombine.high %v537_v39, %v1004_v54  ;;  %v663_v54 = vld [vmem:[%s1156_s4] sm:$0xff]  ;;  %v660_v37 = vld [vmem:[%s1155_s3 + $0x8] sm:$0xff] }
  0xfe   : > { %v625_v53 = vsel %vm609_vm2, %v539_v49, 0.0  ;;  %v636_v57 = vsel %vm609_vm2, %v607_v52, 0.0  ;;  %v635_v59 = vsel %vm609_vm2, %v540_v55, 0.0 }
  0xff   : > { %v627_v56 = vadd.f32 %v626_v51, %v625_v53  ;;  %v637_v61 = vadd.f32 %v636_v57, %v635_v59  ;;  %v646_v63 = vsel %vm609_vm2, %v608_v58, 0.0  ;;  %v645_v0 = vsel %vm609_vm2, %v541_v60, 0.0 }
 0x100   : > { %633 = vadd.xlane.f32.xlu1 %v632_v40  ;;  %v647_v1 = vadd.f32 %v646_v63, %v645_v0 }
 0x104   : > { %643 = vadd.xlane.f32.xlu1 %v642_v45 }
 0x108   : > { %618 = vadd.xlane.f32.xlu1 %v617_v50 }
 0x10c   : > { %628 = vadd.xlane.f32.xlu1 %v627_v56 }
 0x110   : > { %638 = vadd.xlane.f32.xlu1 %v637_v61 }
 0x112   : > { %674 = vperm.xlu0 %967, %v664_v62  }
 0x114   : > { %648 = vadd.xlane.f32.xlu1 %v647_v1 }
 0x125   : > { %669 = vperm.xlu1 %968, %v663_v54  }
 0x129   : > { %679 = vperm.xlu1 %968, %v665_v3  }
 0x12d   : > { %684 = vperm.xlu1 %968, %v666_v4  }
 0x185   : > { %v624_v5 = vpop.xlane.xlu1 %623  ;;  %v614_v7 = vpop.xlane.xlu0 %613 }
 0x186   : > { %v651_v9 = vmul.f32 0.00390625, %v614_v7  ;;  %v653_v12 = vmul.f32 0.00390625, %v624_v5 }
 0x188   : > { %v700_v13 = vrot.slane %v651_v9, %v1081_v30  ;;  %v708_v18 = vrot.slane %v653_v12, %v1081_v30 }
 0x189   : > { %v634_v6 = vpop.xlane.xlu1 %633 }
 0x18a   : > { %v655_v19 = vmul.f32 0.00390625, %v634_v6 }
 0x18c   : > { %v716_v25 = vrot.slane %v655_v19, %v1081_v30 }
 0x18d   : > { %v644_v8 = vpop.xlane.xlu1 %643  ;;  %v675_v41 = vpop.permute.xlu0 %674 }
 0x18e   : > { %v657_v26 = vmul.f32 0.00390625, %v644_v8 }
 0x190   : > { %v724_v33 = vrot.slane %v657_v26, %v1081_v30 }
 0x191   : > { %v619_v10 = vpop.xlane.xlu1 %618 }
 0x192   : > { %v652_v11 = vmul.f32 0.00390625, %v619_v10 }
 0x194   : > { %v704_v14 = vrot.slane %v652_v11, %v1081_v30 }
 0x195   : > { %v629_v15 = vpop.xlane.xlu1 %628 }
 0x196   : > { %v730_v16 = vsel %vm729_vm4, %v704_v14, %v700_v13  ;;  %v654_v17 = vmul.f32 0.00390625, %v629_v15 }
 0x197   : > { %v732_v21 = vsel %vm731_vm5, %v708_v18, %v730_v16 }
 0x198   : > { %v712_v20 = vrot.slane %v654_v17, %v1081_v30 }
 0x199   : > { %v639_v22 = vpop.xlane.xlu1 %638 }
 0x19a   : > { %v734_v23 = vsel %vm733_vm6, %v712_v20, %v732_v21  ;;  %v656_v24 = vmul.f32 0.00390625, %v639_v22 }
 0x19b   : > { %v736_v29 = vsel %vm735_vm7, %v716_v25, %v734_v23 }
 0x19c   : > { %v720_v27 = vrot.slane %v656_v24, %v1081_v30 }
 0x19d   : > { %v649_v28 = vpop.xlane.xlu1 %648 }
 0x19e   : > { %v658_v31 = vmul.f32 0.00390625, %v649_v28  ;;  %v738_v32 = vsel %vm737_vm8, %v720_v27, %v736_v29 }
 0x19f   : > { %v740_v35 = vsel %vm739_vm9, %v724_v33, %v738_v32 }
 0x1a0   : > { %v728_v34 = vrot.slane %v658_v31, %v1081_v30  ;;  %v662_v30 = vld [vmem:[%s1155_s3 + $0x18] sm:$0xff] }
 0x1a1   : > { %v670_v39 = vpop.permute.xlu1 %669 }
 0x1a2   : > { %v742_v36 = vsel %vm741_vm10, %v728_v34, %v740_v35 }
 0x1a3   : > { %946 = vmatprep.subr.mxu1 %v742_v36 }
 0x1a4   : > { %947 = vmatpush3.msra.mxu1 %v742_v36 }
 0x1a5   : > { %949 = vmatmul.mubr.msk.f32.vlgmr.msra.gmra.mxu1 %vm744_vm3, %v660_v37  ;;  %v680_v40 = vpop.permute.xlu1 %679 }
 0x1a6   : > { %951 = vmatprep.mubr.msk.f32.mxu1 %vm744_vm3, %v661_v38 }
 0x1a9   : > { %952 = vmatmul.mubr.msk.f32.gmra.mxu1 %vm744_vm3, %v662_v30  ;;  %v685_v47 = vpop.permute.xlu1 %684 }
 0x265   : > { %v950_v42 = vpop.f32.mrf.mxu1 }
 0x266   : > { %v829_v43 = vadd.f32 %v950_v42, %v675_v41 }
 0x267   : > { %v823_v44 = vpop.f32.mrf.mxu1 }
 0x268   : > { %844 = vst.msk [vmem:[%s224_s24 + $0x8] sm:$0xff] %vm842_vm11, %v829_v43  ;;  %v824_v45 = vadd.f32 %v823_v44, %v670_v39 }
 0x269   : > { %v953_v46 = vpop.f32.mrf.mxu1 }
 0x26a   : > { %843 = vst.msk [vmem:[%s224_s24] sm:$0xff] %vm842_vm11, %v824_v45  ;;  %v839_v48 = vadd.f32 %v953_v46, %v685_v47 }
 0x26b   : > { %v833_v49 = vpop.f32.mrf.mxu1 }
 0x26c   : > { %846 = vst.msk [vmem:[%s224_s24 + $0x18] sm:$0xff] %vm842_vm11, %v839_v48  ;;  %v834_v50 = vadd.f32 %v833_v49, %v680_v40 }
 0x26e   : > { %845 = vst.msk [vmem:[%s224_s24 + $0x10] sm:$0xff] %vm842_vm11, %v834_v50 }
 0x26f PF: > { %s15_s18 = sadd.s32 1, %s999_s18  }
 0x270   : > { %p12_p4 = scmp.ge.s32.totalorder %s15_s18, 4  }
 0x272   :  { %14 = sbr.rel (!%p12_p4) target bundleno = 1 (0x1), region = 70 }

</bundles_post_ra>
